<compile_context>
chip_gen: v5e
topology: v5e:2x2
jax: 0.10.0
libtpu: 0.0.40
codegen_flags: <defaults>
</compile_context>

<pallas_src>
import jax
import jax.numpy as jnp
from jax.experimental import pallas as pl
from jax.experimental.pallas import tpu as pltpu


def _round_up(x, m):
    return (x + m - 1) // m * m


def _patch_embed_kernel(p_ref, w_ref, b_ref, o_ref):
    # p_ref: (tm, K) streaming patch tile (compute dtype)
    # w_ref: (K, E)  resident flattened conv weight (compute dtype)
    # b_ref: (1, E)  resident f32 bias
    # o_ref: (tm, E) output tile
    acc = jnp.dot(p_ref[...], w_ref[...], preferred_element_type=jnp.float32)
    o_ref[...] = (acc + b_ref[...]).astype(o_ref.dtype)


def _vmem_capacity_bytes():
    try:
        return int(pltpu.get_tpu_info().vmem_capacity_bytes)
    except Exception:
        return 64 * 1024 * 1024  # most conservative generation (v7x per-TC)


def _tile_footprint_bytes(tm, K, E, in_itemsize, out_itemsize, single_buffer_resident):
    streaming = 2 * tm * K * in_itemsize + 2 * tm * E * out_itemsize  # double-buffered
    nbuf = 1 if single_buffer_resident else 2
    resident = nbuf * (K * E * in_itemsize + E * 4)
    return streaming + resident


def _pick_tile_m(M, target, row_align):
    """Tile along the patch axis: multiple of row_align, >=2 grid steps when M
    allows it, preferring an exact divisor of M (avoids ragged blocks)."""
    tm = min(max(target, row_align), _round_up(M, row_align))
    if M >= 2 * row_align:                                  # keep >= 2 grid steps
        tm = min(tm, _round_up((M + 1) // 2, row_align))
    tm = max(row_align, (tm // row_align) * row_align)
    t = tm
    while t >= row_align:                                   # prefer a divisor of M
        if M % t == 0:
            return t
        t -= row_align
    return tm


def patch_embed_forward(x, weight, bias, patch_size, *, tile_m=1024,
                        use_bf16=True, out_dtype=None):
    """x: (B, C, H, W); weight: (E, C, ph, pw); bias: (E,)."""
    B, C, H, W = x.shape
    E = weight.shape[0]
    ph, pw = patch_size
    assert H % ph == 0 and W % pw == 0, "image size must be divisible by patch size"
    gh, gw = H // ph, W // pw
    num_patches = gh * gw

    out_dtype = x.dtype if out_dtype is None else out_dtype
    compute_dtype = jnp.bfloat16 if use_bf16 else x.dtype

    # --- host glue: patchify in (C, ph, pw) order to match the PyTorch conv
    # weight layout.  Done in the narrow compute dtype so the transpose pass
    # writes / the kernel reads half the bytes.
    # TODO(synk): fuse this extraction into the kernel (see header comment).
    patches = x.astype(compute_dtype)
    patches = patches.reshape(B, C, gh, ph, gw, pw)
    patches = jnp.transpose(patches, (0, 2, 4, 1, 3, 5))        # (B, gh, gw, C, ph, pw)
    patches = patches.reshape(B * num_patches, C * ph * pw)     # (M, K)

    w_flat = weight.reshape(E, C * ph * pw).T.astype(compute_dtype)  # (K, E), tiny
    b_flat = bias.astype(jnp.float32).reshape(1, E)                  # f32 bias add

    M, K = patches.shape
    in_itemsize = jnp.dtype(compute_dtype).itemsize
    out_itemsize = jnp.dtype(out_dtype).itemsize

    # --- tile selection (no padding, no post-kernel slice).
    row_align = 16 if jnp.dtype(compute_dtype) == jnp.dtype(jnp.bfloat16) else 8
    budget = int(0.6 * _vmem_capacity_bytes())
    tm = _pick_tile_m(M, tile_m, row_align)
    while tm > row_align and _tile_footprint_bytes(
            tm, K, E, in_itemsize, out_itemsize, True) > budget:
        tm = max(row_align, (tm // 2 // row_align) * row_align)
    grid_m = pl.cdiv(M, tm)

    def build_call(single_buffer_resident):
        resident_kwargs = (
            dict(pipeline_mode=pl.Buffered(1)) if single_buffer_resident else {})
        footprint = _tile_footprint_bytes(tm, K, E, in_itemsize, out_itemsize,
                                          single_buffer_resident)
        vmem_limit = max(16 * 1024 * 1024,
                         min(int(1.5 * footprint) + (2 << 20), budget))
        return pl.pallas_call(
            _patch_embed_kernel,
            out_shape=jax.ShapeDtypeStruct((M, E), out_dtype),
            grid_spec=pl.GridSpec(
                grid=(grid_m,),
                in_specs=[
                    pl.BlockSpec((tm, K), lambda i: (i, 0)),              # streaming
                    pl.BlockSpec((K, E), lambda i: (0, 0), **resident_kwargs),
                    pl.BlockSpec((1, E), lambda i: (0, 0), **resident_kwargs),
                ],
                out_specs=pl.BlockSpec((tm, E), lambda i: (i, 0)),
            ),
            compiler_params=pltpu.CompilerParams(
                dimension_semantics=("parallel",),       # megacore-shard M on v7x
                vmem_limit_bytes=vmem_limit,
            ),
            cost_estimate=pl.CostEstimate(
                flops=2 * M * K * E,
                transcendentals=0,
                bytes_accessed=(M * K * in_itemsize + K * E * in_itemsize
                                + M * E * out_itemsize + E * 4),
            ),
        )

    try:
        out_flat = build_call(True)(patches, w_flat, b_flat)
    except Exception:
        # Fallback if this Pallas revision rejects single-buffered resident
        # blocks: identical kernel, default double buffering (one extra weight
        # buffer of VMEM).
        out_flat = build_call(False)(patches, w_flat, b_flat)

    return out_flat.reshape(B, num_patches, E)


def reference_forward(x, weight, bias, patch_size):
    """Pure-JAX reference matching PyTorch Conv2d(k=stride=patch) semantics."""
    out = jax.lax.conv_general_dilated(
        x, weight,
        window_strides=patch_size,
        padding="VALID",
        dimension_numbers=("NCHW", "OIHW", "NCHW"),
    ) + bias.reshape(1, -1, 1, 1)
    B, E, gh, gw = out.shape
    return jnp.transpose(out.reshape(B, E, gh * gw), (0, 2, 1))


if __name__ == "__main__":
    # Small shapes: img_size=16, patch_size=4, in_chans=4, embed_dim=32, B=2
    B, C, H, W = 2, 4, 16, 16
    ph, pw = 4, 4
    E = 32

    key = jax.random.PRNGKey(0)
    kx, kw, kb = jax.random.split(key, 3)
    x = jax.random.normal(kx, (B, C, H, W), dtype=jnp.float32)
    weight = jax.random.normal(kw, (E, C, ph, pw), dtype=jnp.float32) * 0.02
    bias = jax.random.normal(kb, (E,), dtype=jnp.float32) * 0.02

    out = jax.block_until_ready(patch_embed_forward(x, weight, bias, (ph, pw)))
    ref = jax.block_until_ready(reference_forward(x, weight, bias, (ph, pw)))

    assert out.shape == (B, (H // ph) * (W // pw), E), out.shape
    # bf16 inputs on the MXU (f32 accumulation) -> relaxed tolerance.
    assert jnp.allclose(out, ref, atol=2e-2, rtol=2e-2), "mismatch vs reference"

    print("KERNEL_OK")
</pallas_src>

<mosaic_0001>
module attributes {stable_mosaic.version = 11 : i64} {
  func.func @_patch_embed_kernel(%arg0: i32, %arg1: memref<16x64xbf16, #tpu.memory_space<vmem>>, %arg2: memref<64x32xbf16, #tpu.memory_space<vmem>>, %arg3: memref<1x32xf32, #tpu.memory_space<vmem>>, %arg4: memref<16x32xf32, #tpu.memory_space<vmem>>) attributes {dimension_semantics = [#tpu.dimension_semantics<parallel>], iteration_bounds = array<i64: 2>, scalar_prefetch = 0 : i64, scratch_operands = 0 : i64, tpu.core_type = #tpu.core_type<tc>, window_params = [{transform_indices = @transform_0, window_bounds = array<i64: 16, 64>}, {pipeline_mode = #tpu.pipeline_mode<synchronous>, transform_indices = @transform_1, window_bounds = array<i64: 64, 32>}, {pipeline_mode = #tpu.pipeline_mode<synchronous>, transform_indices = @transform_2, window_bounds = array<i64: 1, 32>}, {transform_indices = @transform_3, window_bounds = array<i64: 16, 32>}]} {
    %c0 = arith.constant 0 : index
    %c0_0 = arith.constant 0 : index
    %0 = vector.load %arg1[%c0, %c0_0] : memref<16x64xbf16, #tpu.memory_space<vmem>>, vector<16x64xbf16>
    %c0_1 = arith.constant 0 : index
    %c0_2 = arith.constant 0 : index
    %1 = vector.load %arg2[%c0_1, %c0_2] : memref<64x32xbf16, #tpu.memory_space<vmem>>, vector<64x32xbf16>
    %cst = arith.constant dense<0.000000e+00> : vector<16x32xf32>
    %2 = tpu.matmul %0, %1, %cst {dimension_numbers = #tpu.dot_dimension_numbers<[1], [0], [0], [1], [0, 0, 1, 1], [], []>} : vector<16x64xbf16>, vector<64x32xbf16>, vector<16x32xf32> -> vector<16x32xf32>
    %c0_3 = arith.constant 0 : index
    %c0_4 = arith.constant 0 : index
    %3 = vector.load %arg3[%c0_3, %c0_4] : memref<1x32xf32, #tpu.memory_space<vmem>>, vector<1x32xf32>
    %4 = vector.broadcast %3 : vector<1x32xf32> to vector<16x32xf32>
    %5 = arith.addf %2, %4 : vector<16x32xf32>
    %c0_5 = arith.constant 0 : index
    %c0_6 = arith.constant 0 : index
    %6 = vector.load %arg4[%c0_5, %c0_6] : memref<16x32xf32, #tpu.memory_space<vmem>>, vector<16x32xf32>
    tpu.vector_store %arg4[%c0_5, %c0_6], %5 {strides = array<i32>} : memref<16x32xf32, #tpu.memory_space<vmem>>, vector<16x32xf32>,
    return
  }
  func.func @transform_0(%arg0: i32) -> (i32, i32) {
    %c0_i32 = arith.constant 0 : i32
    %c0_i32_0 = arith.constant 0 : i32
    return %arg0, %c0_i32 : i32, i32
  }
  func.func @transform_1(%arg0: i32) -> (i32, i32) {
    %c0_i32 = arith.constant 0 : i32
    %c0_i32_0 = arith.constant 0 : i32
    %c0_i32_1 = arith.constant 0 : i32
    return %c0_i32, %c0_i32_0 : i32, i32
  }
  func.func @transform_2(%arg0: i32) -> (i32, i32) {
    %c0_i32 = arith.constant 0 : i32
    %c0_i32_0 = arith.constant 0 : i32
    %c0_i32_1 = arith.constant 0 : i32
    return %c0_i32, %c0_i32_0 : i32, i32
  }
  func.func @transform_3(%arg0: i32) -> (i32, i32) {
    %c0_i32 = arith.constant 0 : i32
    %c0_i32_0 = arith.constant 0 : i32
    return %arg0, %c0_i32 : i32, i32
  }
}

module attributes {stable_mosaic.version = 11 : i64} {
  func.func @_patch_embed_kernel(%arg0: i32, %arg1: memref<16x64xbf16, #tpu.memory_space<vmem>>, %arg2: memref<64x32xbf16, #tpu.memory_space<vmem>>, %arg3: memref<1x32xf32, #tpu.memory_space<vmem>>, %arg4: memref<16x32xf32, #tpu.memory_space<vmem>>) attributes {dimension_semantics = [#tpu.dimension_semantics<parallel>], iteration_bounds = array<i64: 2>, scalar_prefetch = 0 : i64, scratch_operands = 0 : i64, tpu.core_type = #tpu.core_type<tc>, window_params = [{transform_indices = @transform_0, window_bounds = array<i64: 16, 64>}, {pipeline_mode = #tpu.pipeline_mode<synchronous>, transform_indices = @transform_1, window_bounds = array<i64: 64, 32>}, {pipeline_mode = #tpu.pipeline_mode<synchronous>, transform_indices = @transform_2, window_bounds = array<i64: 1, 32>}, {transform_indices = @transform_3, window_bounds = array<i64: 16, 32>}]} {
    %c0 = arith.constant 0 : index
    %c0_0 = arith.constant 0 : index
    %0 = vector.load %arg1[%c0, %c0_0] : memref<16x64xbf16, #tpu.memory_space<vmem>>, vector<16x64xbf16>
    %c0_1 = arith.constant 0 : index
    %c0_2 = arith.constant 0 : index
    %1 = vector.load %arg2[%c0_1, %c0_2] : memref<64x32xbf16, #tpu.memory_space<vmem>>, vector<64x32xbf16>
    %cst = arith.constant dense<0.000000e+00> : vector<16x32xf32>
    %2 = tpu.matmul %0, %1, %cst {dimension_numbers = #tpu.dot_dimension_numbers<[1], [0], [0], [1], [0, 0, 1, 1], [], []>} : vector<16x64xbf16>, vector<64x32xbf16>, vector<16x32xf32> -> vector<16x32xf32>
    %c0_3 = arith.constant 0 : index
    %c0_4 = arith.constant 0 : index
    %3 = vector.load %arg3[%c0_3, %c0_4] : memref<1x32xf32, #tpu.memory_space<vmem>>, vector<1x32xf32>
    %4 = vector.broadcast %3 : vector<1x32xf32> to vector<16x32xf32>
    %5 = arith.addf %2, %4 : vector<16x32xf32>
    %c0_5 = arith.constant 0 : index
    %c0_6 = arith.constant 0 : index
    %6 = vector.load %arg4[%c0_5, %c0_6] : memref<16x32xf32, #tpu.memory_space<vmem>>, vector<16x32xf32>
    tpu.vector_store %arg4[%c0_5, %c0_6], %5 {strides = array<i32>} : memref<16x32xf32, #tpu.memory_space<vmem>>, vector<16x32xf32>,
    return
  }
  func.func @transform_0(%arg0: i32) -> (i32, i32) {
    %c0_i32 = arith.constant 0 : i32
    %c0_i32_0 = arith.constant 0 : i32
    return %arg0, %c0_i32 : i32, i32
  }
  func.func @transform_1(%arg0: i32) -> (i32, i32) {
    %c0_i32 = arith.constant 0 : i32
    %c0_i32_0 = arith.constant 0 : i32
    %c0_i32_1 = arith.constant 0 : i32
    return %c0_i32, %c0_i32_0 : i32, i32
  }
  func.func @transform_2(%arg0: i32) -> (i32, i32) {
    %c0_i32 = arith.constant 0 : i32
    %c0_i32_0 = arith.constant 0 : i32
    %c0_i32_1 = arith.constant 0 : i32
    return %c0_i32, %c0_i32_0 : i32, i32
  }
  func.func @transform_3(%arg0: i32) -> (i32, i32) {
    %c0_i32 = arith.constant 0 : i32
    %c0_i32_0 = arith.constant 0 : i32
    return %arg0, %c0_i32 : i32, i32
  }
}

</mosaic_0001>

<bundles_post_ra>
// kernel: tpu_custom_call.1
= control target key start
LH: loop header
LB: loop body
LE: loop exit
PB: predicated region body
PF: predicated region fallthrough
CT: control target
= control target key end

     0   :  { %8 = vsyncpa [#allocation3], 0  ;;  %s581_s0 = inlined_call_operand.vmem [shape: bf16[32,64], index: 0, kind: input, shape index: {}]   ;;  %s582_s1 = inlined_call_operand.vmem [shape: bf16[64,32], index: 1, kind: input, shape index: {}]   ;;  %s583_s2 = inlined_call_operand.vmem [shape: f32[1,32], index: 2, kind: input, shape index: {}]   ;;  %s584_s3 = inlined_call_operand.hbm [shape: f32[32,32], index: 3, kind: output, shape index: {}]  }
   0x1   :  { %10 = vsyncpa [#allocation3 + $0x1], 0  ;;  %s482_s12 = smov 0   ;;  %s484_s13 = smov 0  }
   0x2   :  { %s486_s14 = smov 0   ;;  %s488_s15 = smov 0  }
   0x3 LB: > { %s503_s16 = sadd.s32 4294967295, %s458_s15   ;;  %s315_s17 = sadd.s32 4294967294, %s458_s15   ;;  %s458_s15 = sphi %s488_s15, %s590_s15   ;;  %s454_s14 = sphi %s486_s14, %s589_s14   ;;  %s450_s13 = sphi %s484_s13, %s588_s13   ;;  %s446_s12 = sphi %s482_s12, %s587_s12  }
   0x4   : > { %s507_s18 = sadd.s32 1, %s458_s15   ;;  %s91_s19 = sadd.s32 1, %s454_s14 }
   0x5   : > { %s88_s20 = ssub.s32 %s458_s15, %s507_s18  ;;  %p101_p0 = scmp.ne.s32.totalorder %s454_s14, %s450_s13 }
   0x6   : > { %p89_p1 = scmp.eq.s32.totalorder %s88_s20, 0  ;;  %p102_p2 = scmp.eq.s32.totalorder %s503_s16, 1 }
   0x7   : > { %p107_p3 = scmp.ne.s32.totalorder %s450_s13, %s446_s12  ;;  %p108_p4 = scmp.eq.s32.totalorder %s315_s17, 1 }
   0x8   : > { %s518_s21 = scalar_select %p89_p1, %s454_s14, %s91_s19  }
   0x9   : > { %p520_p5 = por %p102_p2, %p101_p0  ;;  %p524_p6 = por %p108_p4, %p107_p3 }
   0xa   : > { %p318_p7 = scmp.ge.s32.totalorder %s458_s15, 1  ;;  %p141_p8 = scmp.lt.s32.totalorder %s458_s15, 3 }
   0xc   : > { %p142_p9 = pnand %p318_p7, %p141_p8 }
   0xd   : > { %s320_s26 = sshll.u32 (!%p142_p9), %s503_s16, 1  ;;  %s162_s10 = sand.u32 (!%p142_p9), 1, %s450_s13  }
   0xe   : > { %145 = sbr.rel (%p142_p9) target bundleno = 175 (0xaf), region = 32  ;;  %p166_p10 = scmp.lt.s32.totalorder (!%p142_p9), %s320_s26, 3 }
   0xf   : > { %s319_s11 = sshll.u32 (!%p142_p9), %s162_s10, 4  ;;  %s353_s20 = sshll.u32 (!%p142_p9), %s503_s16, 4 }
  0x10   : > { %s164_s27 = scalar_lea.vmem (!%p142_p9), [#allocation2], %s319_s11  ;;  %s238_s30 = scalar_lea.sflag (!%p142_p9), [#allocation3], %s162_s10 }
  0x11   : > { %s250_s28 = sshll.u32 (!%p142_p9), %s164_s27, 4  ;;  %s416_s7 = scalar_lea.hbm (!%p142_p9), %s584_s3, 32  ;;  %s251_s28 = int_to_ptr.vmem [resolvable:$true] %s250_s28 }
  0x13   : > { %v352_v0 = vld [vmem:[%s582_s1 + $0x18] sm:$0xff]  ;;  %v351_v1 = vld [vmem:[%s582_s1 + $0x10] sm:$0xff]  ;;  %s592_s26 = smov (!%p166_p10, %s320_s26), 3  ;;  %v350_v2 = vld [vmem:[%s582_s1 + $0x8] sm:$0xff]  ;;  %vm216_vm0 = vcmask 523264   ;;  %vm234_vm1 = vcmask 261120  }
  0x14   : > { %224 = vmatpush.bf16.msra.mxu0 %v352_v0  ;;  %s321_s4 = sshll.u32 %s592_s26, 2  ;;  %v349_v3 = vld [vmem:[%s582_s1] sm:$0xff]  ;;  %s249_s26 = scalar_lea.hbm %s584_s3, %s353_s20 }
  0x15   : > { %s169_s9 = scalar_lea.vmem %s581_s0, %s321_s4  ;;  %v395_v5 = vld [vmem:[%s583_s2] ss:$0 sm:$0xff]  ;;  %s252_s29 = sshll.u32 %s249_s26, 4  ;;  %s253_s29 = int_to_ptr.hbm [resolvable:$true] %s252_s29 }
  0x16   : > { %v348_v4 = vld [vmem:[%s169_s9] sm:$0xff]  ;;  %s410_s4 = sshra.s32 %s253_s29, 4  ;;  %s411_s4 = int_to_ptr.hbm [resolvable:$true] %s410_s4 }
  0x17   : > { %s412_s16 = scalar_lea.hbm %s411_s4, 16  ;;  %p417_p0 = scmp.lt.s32.totalorder %s411_s4, %s584_s3 }
  0x18   : > { %225 = vmatpush.bf16.msra.mxu0 %v351_v1  ;;  %p413_p11 = scmp.ne.s32.totalorder %s411_s4, %s412_s16  ;;  %p418_p1 = scmp.lt.s32.totalorder %s416_s7, %s412_s16 }
  0x1a   : > { %p414_p12 = pnand %p413_p11, %p520_p5  ;;  %p419_p2 = por %p418_p1, %p417_p0 }
  0x1c   : > { %226 = vmatpush.bf16.msra.mxu0 %v350_v2  ;;  %p415_p13 = pneg %p414_p12 }
  0x1e   : > { %p420_p3 = pnand %p419_p2, %p415_p13 }
  0x20   : > { %227 = vmatpush.bf16.msra.mxu0 %v349_v3 }
  0x23   : > { %342 = vmatmul.msk.bf16.vlgmr.msra.gmra.mxu0 %vm216_vm0, %v348_v4 }
  0xa0   : > { %v229_v6 = vpop.f32.mrf.mxu0 }
  0xa1   : > { %v230_v7 = vadd.f32 %v395_v5, %v229_v6 }
  0xa3   : > { %235 = vst.msk [vmem:[%s164_s27] sm:$0xff] %vm234_vm1, %v230_v7 }
  0xa8   : > { %v231_v8 = vpop.f32.mrf.mxu0 }
  0xa9   : > { %v232_v9 = vadd.f32 %v395_v5, %v231_v8 }
  0xab   : > { %236 = vst.msk [vmem:[%s164_s27 + $0x8] sm:$0xff] %vm234_vm1, %v232_v9 }
  0xac   : > { %423 = shalt.err (!%p420_p3)
}
  0xad   : > { %s460_s10 = smov 128   ;;  %s461_s11 = smov 8  }
  0xae   : > { %354 = dma.vmem_to_hbm [thread:$0]  (%p520_p5), %s251_s28, 256, %s253_s29, %s238_s30, %s460_s10, %s460_s10, %s461_s11  }
  0xaf PF: > { %p360_p4 = scmp.ge.s32.totalorder %s458_s15, 2  ;;  %s267_s17 = sand.u32 1, %s446_s12  }
  0xb0   : > { %s268_s19 = scalar_lea.sflag [#allocation3], %s267_s17 }
  0xb1   : > { %p357_p7 = pnand %p360_p4, %p524_p6 }
  0xb3   : > { %p358_p8 = pneg %p357_p7 }
  0xb5   : > { %441 = dma.done.wait (%p358_p8), %s268_s19, 256  }
  0xb6   : > { %443 = vsyncadd (%p358_p8), %s268_s19, 4294967040  ;;  %p13_p9 = scmp.ge.s32.totalorder %s507_s18, 4   ;;  %s587_s12 = smov %s450_s13 }
  0xb7   : > { %s588_s13 = smov %s454_s14  ;;  %s589_s14 = smov %s518_s21 }
  0xb8   : > { %s590_s15 = smov %s507_s18  ;;  %15 = sbr.rel (!%p13_p9) target bundleno = 3 (0x3), region = 67 }
  0xbd   :  { %274 = vsyncpa [#allocation3], 1 }
  0xbe   :  { %276 = vsyncpa [#allocation3 + $0x1], 1 }

// kernel: tpu_custom_call.1
= control target key start
LH: loop header
LB: loop body
LE: loop exit
PB: predicated region body
PF: predicated region fallthrough
CT: control target
= control target key end

     0   :  { %8 = vsyncpa [#allocation3], 0  ;;  %s581_s0 = inlined_call_operand.vmem [shape: bf16[32,64], index: 0, kind: input, shape index: {}]   ;;  %s582_s1 = inlined_call_operand.vmem [shape: bf16[64,32], index: 1, kind: input, shape index: {}]   ;;  %s583_s2 = inlined_call_operand.vmem [shape: f32[1,32], index: 2, kind: input, shape index: {}]   ;;  %s584_s3 = inlined_call_operand.hbm [shape: f32[32,32], index: 3, kind: output, shape index: {}]  }
   0x1   :  { %10 = vsyncpa [#allocation3 + $0x1], 0  ;;  %s482_s12 = smov 0   ;;  %s484_s13 = smov 0  }
   0x2   :  { %s486_s14 = smov 0   ;;  %s488_s15 = smov 0  }
   0x3 LB: > { %s503_s16 = sadd.s32 4294967295, %s458_s15   ;;  %s315_s17 = sadd.s32 4294967294, %s458_s15   ;;  %s458_s15 = sphi %s488_s15, %s590_s15   ;;  %s454_s14 = sphi %s486_s14, %s589_s14   ;;  %s450_s13 = sphi %s484_s13, %s588_s13   ;;  %s446_s12 = sphi %s482_s12, %s587_s12  }
   0x4   : > { %s507_s18 = sadd.s32 1, %s458_s15   ;;  %s91_s19 = sadd.s32 1, %s454_s14 }
   0x5   : > { %s88_s20 = ssub.s32 %s458_s15, %s507_s18  ;;  %p101_p0 = scmp.ne.s32.totalorder %s454_s14, %s450_s13 }
   0x6   : > { %p89_p1 = scmp.eq.s32.totalorder %s88_s20, 0  ;;  %p102_p2 = scmp.eq.s32.totalorder %s503_s16, 1 }
   0x7   : > { %p107_p3 = scmp.ne.s32.totalorder %s450_s13, %s446_s12  ;;  %p108_p4 = scmp.eq.s32.totalorder %s315_s17, 1 }
   0x8   : > { %s518_s21 = scalar_select %p89_p1, %s454_s14, %s91_s19  }
   0x9   : > { %p520_p5 = por %p102_p2, %p101_p0  ;;  %p524_p6 = por %p108_p4, %p107_p3 }
   0xa   : > { %p318_p7 = scmp.ge.s32.totalorder %s458_s15, 1  ;;  %p141_p8 = scmp.lt.s32.totalorder %s458_s15, 3 }
   0xc   : > { %p142_p9 = pnand %p318_p7, %p141_p8 }
   0xd   : > { %s320_s26 = sshll.u32 (!%p142_p9), %s503_s16, 1  ;;  %s162_s10 = sand.u32 (!%p142_p9), 1, %s450_s13  }
   0xe   : > { %145 = sbr.rel (%p142_p9) target bundleno = 175 (0xaf), region = 32  ;;  %p166_p10 = scmp.lt.s32.totalorder (!%p142_p9), %s320_s26, 3 }
   0xf   : > { %s319_s11 = sshll.u32 (!%p142_p9), %s162_s10, 4  ;;  %s353_s20 = sshll.u32 (!%p142_p9), %s503_s16, 4 }
  0x10   : > { %s164_s27 = scalar_lea.vmem (!%p142_p9), [#allocation2], %s319_s11  ;;  %s238_s30 = scalar_lea.sflag (!%p142_p9), [#allocation3], %s162_s10 }
  0x11   : > { %s250_s28 = sshll.u32 (!%p142_p9), %s164_s27, 4  ;;  %s416_s7 = scalar_lea.hbm (!%p142_p9), %s584_s3, 32  ;;  %s251_s28 = int_to_ptr.vmem [resolvable:$true] %s250_s28 }
  0x13   : > { %v352_v0 = vld [vmem:[%s582_s1 + $0x18] sm:$0xff]  ;;  %v351_v1 = vld [vmem:[%s582_s1 + $0x10] sm:$0xff]  ;;  %s592_s26 = smov (!%p166_p10, %s320_s26), 3  ;;  %v350_v2 = vld [vmem:[%s582_s1 + $0x8] sm:$0xff]  ;;  %vm216_vm0 = vcmask 523264   ;;  %vm234_vm1 = vcmask 261120  }
  0x14   : > { %224 = vmatpush.bf16.msra.mxu0 %v352_v0  ;;  %s321_s4 = sshll.u32 %s592_s26, 2  ;;  %v349_v3 = vld [vmem:[%s582_s1] sm:$0xff]  ;;  %s249_s26 = scalar_lea.hbm %s584_s3, %s353_s20 }
  0x15   : > { %s169_s9 = scalar_lea.vmem %s581_s0, %s321_s4  ;;  %v395_v5 = vld [vmem:[%s583_s2] ss:$0 sm:$0xff]  ;;  %s252_s29 = sshll.u32 %s249_s26, 4  ;;  %s253_s29 = int_to_ptr.hbm [resolvable:$true] %s252_s29 }
  0x16   : > { %v348_v4 = vld [vmem:[%s169_s9] sm:$0xff]  ;;  %s410_s4 = sshra.s32 %s253_s29, 4  ;;  %s411_s4 = int_to_ptr.hbm [resolvable:$true] %s410_s4 }
  0x17   : > { %s412_s16 = scalar_lea.hbm %s411_s4, 16  ;;  %p417_p0 = scmp.lt.s32.totalorder %s411_s4, %s584_s3 }
  0x18   : > { %225 = vmatpush.bf16.msra.mxu0 %v351_v1  ;;  %p413_p11 = scmp.ne.s32.totalorder %s411_s4, %s412_s16  ;;  %p418_p1 = scmp.lt.s32.totalorder %s416_s7, %s412_s16 }
  0x1a   : > { %p414_p12 = pnand %p413_p11, %p520_p5  ;;  %p419_p2 = por %p418_p1, %p417_p0 }
  0x1c   : > { %226 = vmatpush.bf16.msra.mxu0 %v350_v2  ;;  %p415_p13 = pneg %p414_p12 }
  0x1e   : > { %p420_p3 = pnand %p419_p2, %p415_p13 }
  0x20   : > { %227 = vmatpush.bf16.msra.mxu0 %v349_v3 }
  0x23   : > { %342 = vmatmul.msk.bf16.vlgmr.msra.gmra.mxu0 %vm216_vm0, %v348_v4 }
  0xa0   : > { %v229_v6 = vpop.f32.mrf.mxu0 }
  0xa1   : > { %v230_v7 = vadd.f32 %v395_v5, %v229_v6 }
  0xa3   : > { %235 = vst.msk [vmem:[%s164_s27] sm:$0xff] %vm234_vm1, %v230_v7 }
  0xa8   : > { %v231_v8 = vpop.f32.mrf.mxu0 }
  0xa9   : > { %v232_v9 = vadd.f32 %v395_v5, %v231_v8 }
  0xab   : > { %236 = vst.msk [vmem:[%s164_s27 + $0x8] sm:$0xff] %vm234_vm1, %v232_v9 }
  0xac   : > { %423 = shalt.err (!%p420_p3)
}
  0xad   : > { %s460_s10 = smov 128   ;;  %s461_s11 = smov 8  }
  0xae   : > { %354 = dma.vmem_to_hbm [thread:$0]  (%p520_p5), %s251_s28, 256, %s253_s29, %s238_s30, %s460_s10, %s460_s10, %s461_s11  }
  0xaf PF: > { %p360_p4 = scmp.ge.s32.totalorder %s458_s15, 2  ;;  %s267_s17 = sand.u32 1, %s446_s12  }
  0xb0   : > { %s268_s19 = scalar_lea.sflag [#allocation3], %s267_s17 }
  0xb1   : > { %p357_p7 = pnand %p360_p4, %p524_p6 }
  0xb3   : > { %p358_p8 = pneg %p357_p7 }
  0xb5   : > { %441 = dma.done.wait (%p358_p8), %s268_s19, 256  }
  0xb6   : > { %443 = vsyncadd (%p358_p8), %s268_s19, 4294967040  ;;  %p13_p9 = scmp.ge.s32.totalorder %s507_s18, 4   ;;  %s587_s12 = smov %s450_s13 }
  0xb7   : > { %s588_s13 = smov %s454_s14  ;;  %s589_s14 = smov %s518_s21 }
  0xb8   : > { %s590_s15 = smov %s507_s18  ;;  %15 = sbr.rel (!%p13_p9) target bundleno = 3 (0x3), region = 67 }
  0xbd   :  { %274 = vsyncpa [#allocation3], 1 }
  0xbe   :  { %276 = vsyncpa [#allocation3 + $0x1], 1 }

</bundles_post_ra>
